<compile_context>
chip_gen: v7x
topology: tpu7x:2x2x1
jax: 0.10.0
libtpu: 0.0.40
codegen_flags: <defaults>
</compile_context>

<pallas_src>
import functools

import jax
import jax.numpy as jnp
from jax.experimental import pallas as pl
from jax.experimental.pallas import tpu as pltpu

LANES = 128
SUBLANES = 8
DEFAULT_ROW_TILE = 2048   # (2048, 128) f32 block = 1 MiB per input per buffer


def _make_kernel(rt: int, steps: int, rows_valid: int):
    """Kernel closed over static tile rows, steps-per-split and valid rows."""
    groups = rt // SUBLANES

    def tile_reduce(x):
        # (rt, 128) -> (8, 128): sum whole (8,128) sub-tiles.  The reshape is
        # layout preserving (each sub-tile is one vreg tile) and the reduction
        # over the leading axis lowers to plain vector adds.
        return jnp.sum(x.reshape(groups, SUBLANES, LANES), axis=0)

    def kernel(p_ref, t_ref, out_ref, sp, st, sp2, st2, spt):
        c = pl.program_id(0)   # split index ("parallel": one per TC on v7x)
        i = pl.program_id(1)   # step within the split (reduction axis)

        # ---- init per-split accumulators -----------------------------------
        @pl.when(i == 0)
        def _init():
            for acc in (sp, st, sp2, st2, spt):
                acc[...] = jnp.zeros_like(acc)

        p = p_ref[...].astype(jnp.float32)
        t = t_ref[...].astype(jnp.float32)

        def accumulate(pv, tv):
            sp[...] += tile_reduce(pv)
            st[...] += tile_reduce(tv)
            sp2[...] += tile_reduce(pv * pv)
            st2[...] += tile_reduce(tv * tv)
            spt[...] += tile_reduce(pv * tv)

        row0 = (c * steps + i) * rt   # logical first row of this block

        # Hot path: block fully inside the valid rows -> no masking.
        @pl.when(row0 + rt <= rows_valid)
        def _full_tile():
            accumulate(p, t)

        # Boundary (or fully out-of-range overshoot) block: rows past the end
        # of the array contain unspecified data -> zero them before use.
        @pl.when(row0 + rt > rows_valid)
        def _boundary_tile():
            rows = row0 + jax.lax.broadcasted_iota(jnp.int32, (rt, LANES), 0)
            keep = rows < rows_valid
            accumulate(jnp.where(keep, p, 0.0), jnp.where(keep, t, 0.0))

        # ---- emit this split's partial sums ---------------------------------
        @pl.when(i == steps - 1)
        def _finalize():
            out_ref[0, 0] = sp[...]
            out_ref[0, 1] = st[...]
            out_ref[0, 2] = sp2[...]
            out_ref[0, 3] = st2[...]
            out_ref[0, 4] = spt[...]

    return kernel


@functools.partial(jax.jit, static_argnames=("row_tile",))
def kge_mse_loss(predictions, targets, alpha, *, row_tile=DEFAULT_ROW_TILE):
    # Flatten (== torch .view(-1)); stream native floating dtype (cast to f32
    # happens in-register inside the kernel).
    p = jnp.asarray(predictions).reshape(-1)
    t = jnp.asarray(targets).reshape(-1)
    if not jnp.issubdtype(p.dtype, jnp.floating):
        p = p.astype(jnp.float32)
    if not jnp.issubdtype(t.dtype, jnp.floating):
        t = t.astype(jnp.float32)

    n_total = p.shape[0]
    assert t.shape[0] == n_total, "predictions/targets must have same numel"

    rows_needed = pl.cdiv(n_total, LANES)

    # Tile rows: largest multiple of 32 (covers bf16/int8 packing) not
    # exceeding the requested tile or the data; minimum of 8 rows.
    if rows_needed >= 32:
        rt = min(row_tile, (rows_needed // 32) * 32)
    else:
        rt = max(SUBLANES, (rows_needed // SUBLANES) * SUBLANES)

    if n_total % LANES == 0 and rows_needed >= rt:
        # Fast path: the flat -> (rows, 128) reshape is free (no copy).  A
        # ragged last block (rows % rt != 0) is handled by the in-kernel mask.
        rows_arr = rows_needed
    else:
        # A copy is unavoidable here (numel not a multiple of 128, or fewer
        # rows than one block), so pad all the way to whole blocks.  Zero
        # padding contributes 0 to every sum; the true N is used below.
        blocks = max(1, pl.cdiv(rows_needed, rt))
        rows_arr = blocks * rt
        pad = rows_arr * LANES - n_total
        p = jnp.pad(p, (0, pad))
        t = jnp.pad(t, (0, pad))

    p2 = p.reshape(rows_arr, LANES)
    t2 = t.reshape(rows_arr, LANES)

    blocks_total = pl.cdiv(rows_arr, rt)
    n_splits = 2 if blocks_total > 1 else 1      # 2 TensorCores on v7x
    steps = pl.cdiv(blocks_total, n_splits)
    last_block = blocks_total - 1

    def in_map(c, i):
        # A split may overshoot by one block; clamp the DMA to the last valid
        # block (its contents are fully masked in-kernel).
        return (jnp.minimum(c * steps + i, last_block), 0)

    kernel = _make_kernel(rt, steps, rows_arr)
    partials = pl.pallas_call(
        kernel,
        out_shape=jax.ShapeDtypeStruct((n_splits, 5, SUBLANES, LANES),
                                       jnp.float32),
        grid_spec=pltpu.PrefetchScalarGridSpec(
            num_scalar_prefetch=0,
            grid=(n_splits, steps),
            in_specs=[
                pl.BlockSpec((rt, LANES), in_map),     # predictions
                pl.BlockSpec((rt, LANES), in_map),     # targets
            ],
            out_specs=pl.BlockSpec((1, 5, SUBLANES, LANES),
                                   lambda c, i: (c, 0, 0, 0)),
            scratch_shapes=[pltpu.VMEM((SUBLANES, LANES), jnp.float32)] * 5,
        ),
        compiler_params=pltpu.CompilerParams(
            dimension_semantics=("parallel", "arbitrary"),
        ),
    )(p2, t2)

    # ---- tiny scalar epilogue on the combined partial sums (plain JAX) -----
    sums = jnp.sum(partials, axis=(0, 2, 3), dtype=jnp.float32)   # (5,)
    s_p, s_t, s_p2, s_t2, s_pt = sums[0], sums[1], sums[2], sums[3], sums[4]
    n = jnp.float32(n_total)
    alpha = jnp.asarray(alpha, jnp.float32)

    mean_p = s_p / n
    mean_t = s_t / n
    # torch.std defaults to the unbiased (N-1) estimator; clamp var >= 0 to
    # guard against f32 cancellation in the single-pass formula.
    var_p = jnp.maximum((s_p2 - n * mean_p * mean_p) / (n - 1.0), 0.0)
    var_t = jnp.maximum((s_t2 - n * mean_t * mean_t) / (n - 1.0), 0.0)
    std_p = jnp.sqrt(var_p)
    std_t = jnp.sqrt(var_t)
    cov = s_pt / n - mean_p * mean_t              # mean((p-mp)*(t-mt))
    corr = cov / (std_p * std_t + 1e-8)
    beta = mean_p / mean_t
    gamma = (std_p / mean_p) / (std_t / mean_t)
    kge = 1.0 - jnp.sqrt((corr - 1.0) ** 2 + (beta - 1.0) ** 2
                         + (gamma - 1.0) ** 2)
    mae = jnp.abs((s_t - s_p) / n)                # |sum(t - p)| / N
    return alpha * (1.0 - kge) + (1.0 - alpha) * mae


def _reference(p, t, a):
    """Pure-JAX mirror of the PyTorch forward for a correctness check."""
    p = p.reshape(-1).astype(jnp.float32)
    t = t.reshape(-1).astype(jnp.float32)
    mp = jnp.mean(p)
    mt = jnp.mean(t)
    sp_ = jnp.std(p, ddof=1)
    st_ = jnp.std(t, ddof=1)
    cov = jnp.mean((p - mp) * (t - mt))
    corr = cov / (sp_ * st_ + 1e-8)
    beta = mp / mt
    gamma = (sp_ / mp) / (st_ / mt)
    kge = 1.0 - jnp.sqrt((corr - 1.0) ** 2 + (beta - 1.0) ** 2
                         + (gamma - 1.0) ** 2)
    mae = jnp.abs(jnp.sum(t - p) / t.shape[0])
    return a * (1.0 - kge) + (1.0 - a) * mae


if __name__ == "__main__":
    key = jax.random.PRNGKey(0)
    k1, k2 = jax.random.split(key)

    # 1) aligned shapes (numel multiple of 128 -> zero-copy streaming path);
    #    offset away from zero so beta/gamma divisions are well-posed.
    predictions = jax.random.uniform(k1, (2, 4, 16, 16), jnp.float32) + 0.5
    targets = jax.random.uniform(k2, (2, 4, 16, 16), jnp.float32) + 0.5
    alpha = 0.6
    out = jax.block_until_ready(kge_mse_loss(predictions, targets, alpha))
    expected = _reference(predictions, targets, jnp.float32(alpha))
    assert jnp.allclose(out, expected, rtol=2e-4, atol=2e-5), (out, expected)

    # 2) non-multiple-of-128 numel + bf16 inputs: exercises the padded path
    #    and native-dtype streaming with in-register f32 cast.
    k3, k4 = jax.random.split(k2)
    p_odd = jax.random.uniform(k3, (3, 5, 7, 11), jnp.float32) + 0.5
    t_odd = jax.random.uniform(k4, (3, 5, 7, 11), jnp.float32) + 0.5
    out2 = jax.block_until_ready(
        kge_mse_loss(p_odd.astype(jnp.bfloat16), t_odd.astype(jnp.bfloat16),
                     0.3))
    exp2 = _reference(p_odd.astype(jnp.bfloat16), t_odd.astype(jnp.bfloat16),
                      jnp.float32(0.3))
    assert jnp.allclose(out2, exp2, rtol=2e-2, atol=2e-3), (out2, exp2)

    # 3) aligned but ragged rows (40 rows, 32-row tile): exercises the
    #    zero-copy path with a masked boundary block and the 2-split grid.
    k5, k6 = jax.random.split(k4)
    p_rag = jax.random.uniform(k5, (5, 8, 128), jnp.float32) + 0.5
    t_rag = jax.random.uniform(k6, (5, 8, 128), jnp.float32) + 0.5
    out3 = jax.block_until_ready(kge_mse_loss(p_rag, t_rag, 0.5))
    exp3 = _reference(p_rag, t_rag, jnp.float32(0.5))
    assert jnp.allclose(out3, exp3, rtol=2e-4, atol=2e-5), (out3, exp3)

    print("KERNEL_OK")
</pallas_src>

<mosaic_0001>
module attributes {stable_mosaic.version = 11 : i64} {
  func.func @kernel(%arg0: i32, %arg1: i32, %arg2: memref<16x128xf32, #tpu.memory_space<vmem>>, %arg3: memref<16x128xf32, #tpu.memory_space<vmem>>, %arg4: memref<1x5x8x128xf32, #tpu.memory_space<vmem>>, %arg5: memref<8x128xf32, #tpu.memory_space<vmem>>, %arg6: memref<8x128xf32, #tpu.memory_space<vmem>>, %arg7: memref<8x128xf32, #tpu.memory_space<vmem>>, %arg8: memref<8x128xf32, #tpu.memory_space<vmem>>, %arg9: memref<8x128xf32, #tpu.memory_space<vmem>>) attributes {dimension_semantics = [#tpu.dimension_semantics<parallel>, #tpu.dimension_semantics<arbitrary>], iteration_bounds = array<i64: 1, 1>, scalar_prefetch = 0 : i64, scratch_operands = 5 : i64, tpu.core_type = #tpu.core_type<tc>, window_params = [{transform_indices = @transform_0, window_bounds = array<i64: 16, 128>}, {transform_indices = @transform_1, window_bounds = array<i64: 16, 128>}, {transform_indices = @transform_2, window_bounds = array<i64: 1, 5, 8, 128>}]} {
    %c0_i32 = arith.constant 0 : i32
    %0 = arith.cmpi eq, %arg1, %c0_i32 : i32
    %1 = arith.extui %0 : i1 to i32
    %c0_i32_0 = arith.constant 0 : i32
    %2 = arith.cmpi ne, %1, %c0_i32_0 : i32
    scf.if %2 {
      %cst = arith.constant 0.000000e+00 : f32
      %19 = vector.broadcast %cst : f32 to vector<8x128xf32>
      %c0_12 = arith.constant 0 : index
      %c0_13 = arith.constant 0 : index
      %20 = vector.load %arg5[%c0_12, %c0_13] : memref<8x128xf32, #tpu.memory_space<vmem>>, vector<8x128xf32>
      tpu.vector_store %arg5[%c0_12, %c0_13], %19 {strides = array<i32>} : memref<8x128xf32, #tpu.memory_space<vmem>>, vector<8x128xf32>,
      %cst_14 = arith.constant 0.000000e+00 : f32
      %21 = vector.broadcast %cst_14 : f32 to vector<8x128xf32>
      %c0_15 = arith.constant 0 : index
      %c0_16 = arith.constant 0 : index
      %22 = vector.load %arg6[%c0_15, %c0_16] : memref<8x128xf32, #tpu.memory_space<vmem>>, vector<8x128xf32>
      tpu.vector_store %arg6[%c0_15, %c0_16], %21 {strides = array<i32>} : memref<8x128xf32, #tpu.memory_space<vmem>>, vector<8x128xf32>,
      %cst_17 = arith.constant 0.000000e+00 : f32
      %23 = vector.broadcast %cst_17 : f32 to vector<8x128xf32>
      %c0_18 = arith.constant 0 : index
      %c0_19 = arith.constant 0 : index
      %24 = vector.load %arg7[%c0_18, %c0_19] : memref<8x128xf32, #tpu.memory_space<vmem>>, vector<8x128xf32>
      tpu.vector_store %arg7[%c0_18, %c0_19], %23 {strides = array<i32>} : memref<8x128xf32, #tpu.memory_space<vmem>>, vector<8x128xf32>,
      %cst_20 = arith.constant 0.000000e+00 : f32
      %25 = vector.broadcast %cst_20 : f32 to vector<8x128xf32>
      %c0_21 = arith.constant 0 : index
      %c0_22 = arith.constant 0 : index
      %26 = vector.load %arg8[%c0_21, %c0_22] : memref<8x128xf32, #tpu.memory_space<vmem>>, vector<8x128xf32>
      tpu.vector_store %arg8[%c0_21, %c0_22], %25 {strides = array<i32>} : memref<8x128xf32, #tpu.memory_space<vmem>>, vector<8x128xf32>,
      %cst_23 = arith.constant 0.000000e+00 : f32
      %27 = vector.broadcast %cst_23 : f32 to vector<8x128xf32>
      %c0_24 = arith.constant 0 : index
      %c0_25 = arith.constant 0 : index
      %28 = vector.load %arg9[%c0_24, %c0_25] : memref<8x128xf32, #tpu.memory_space<vmem>>, vector<8x128xf32>
      tpu.vector_store %arg9[%c0_24, %c0_25], %27 {strides = array<i32>} : memref<8x128xf32, #tpu.memory_space<vmem>>, vector<8x128xf32>,
    } else {
    }
    %c0 = arith.constant 0 : index
    %c0_1 = arith.constant 0 : index
    %3 = vector.load %arg2[%c0, %c0_1] : memref<16x128xf32, #tpu.memory_space<vmem>>, vector<16x128xf32>
    %c0_2 = arith.constant 0 : index
    %c0_3 = arith.constant 0 : index
    %4 = vector.load %arg3[%c0_2, %c0_3] : memref<16x128xf32, #tpu.memory_space<vmem>>, vector<16x128xf32>
    %c1_i32 = arith.constant 1 : i32
    %5 = arith.muli %arg0, %c1_i32 : i32
    %6 = arith.addi %5, %arg1 : i32
    %c16_i32 = arith.constant 16 : i32
    %7 = arith.muli %6, %c16_i32 : i32
    %c16_i32_4 = arith.constant 16 : i32
    %8 = arith.addi %7, %c16_i32_4 : i32
    %c16_i32_5 = arith.constant 16 : i32
    %9 = arith.cmpi sle, %8, %c16_i32_5 : i32
    %10 = arith.extui %9 : i1 to i32
    %c0_i32_6 = arith.constant 0 : i32
    %11 = arith.cmpi ne, %10, %c0_i32_6 : i32
    scf.if %11 {
      %c0_12 = arith.constant 0 : index
      %c0_13 = arith.constant 0 : index
      %19 = vector.load %arg5[%c0_12, %c0_13] : memref<8x128xf32, #tpu.memory_space<vmem>>, vector<8x128xf32>
      %20 = vector.shape_cast %3 : vector<16x128xf32> to vector<2x8x128xf32>
      %cst = arith.constant dense<0.000000e+00> : vector<8x128xf32>
      %21 = vector.multi_reduction <add>, %20, %cst [0] : vector<2x8x128xf32> to vector<8x128xf32>
      %22 = arith.addf %19, %21 : vector<8x128xf32>
      %c0_14 = arith.constant 0 : index
      %c0_15 = arith.constant 0 : index
      %23 = vector.load %arg5[%c0_14, %c0_15] : memref<8x128xf32, #tpu.memory_space<vmem>>, vector<8x128xf32>
      tpu.vector_store %arg5[%c0_14, %c0_15], %22 {strides = array<i32>} : memref<8x128xf32, #tpu.memory_space<vmem>>, vector<8x128xf32>,
      %c0_16 = arith.constant 0 : index
      %c0_17 = arith.constant 0 : index
      %24 = vector.load %arg6[%c0_16, %c0_17] : memref<8x128xf32, #tpu.memory_space<vmem>>, vector<8x128xf32>
      %25 = vector.shape_cast %4 : vector<16x128xf32> to vector<2x8x128xf32>
      %cst_18 = arith.constant dense<0.000000e+00> : vector<8x128xf32>
      %26 = vector.multi_reduction <add>, %25, %cst_18 [0] : vector<2x8x128xf32> to vector<8x128xf32>
      %27 = arith.addf %24, %26 : vector<8x128xf32>
      %c0_19 = arith.constant 0 : index
      %c0_20 = arith.constant 0 : index
      %28 = vector.load %arg6[%c0_19, %c0_20] : memref<8x128xf32, #tpu.memory_space<vmem>>, vector<8x128xf32>
      tpu.vector_store %arg6[%c0_19, %c0_20], %27 {strides = array<i32>} : memref<8x128xf32, #tpu.memory_space<vmem>>, vector<8x128xf32>,
      %c0_21 = arith.constant 0 : index
      %c0_22 = arith.constant 0 : index
      %29 = vector.load %arg7[%c0_21, %c0_22] : memref<8x128xf32, #tpu.memory_space<vmem>>, vector<8x128xf32>
      %30 = arith.mulf %3, %3 : vector<16x128xf32>
      %31 = vector.shape_cast %30 : vector<16x128xf32> to vector<2x8x128xf32>
      %cst_23 = arith.constant dense<0.000000e+00> : vector<8x128xf32>
      %32 = vector.multi_reduction <add>, %31, %cst_23 [0] : vector<2x8x128xf32> to vector<8x128xf32>
      %33 = arith.addf %29, %32 : vector<8x128xf32>
      %c0_24 = arith.constant 0 : index
      %c0_25 = arith.constant 0 : index
      %34 = vector.load %arg7[%c0_24, %c0_25] : memref<8x128xf32, #tpu.memory_space<vmem>>, vector<8x128xf32>
      tpu.vector_store %arg7[%c0_24, %c0_25], %33 {strides = array<i32>} : memref<8x128xf32, #tpu.memory_space<vmem>>, vector<8x128xf32>,
      %c0_26 = arith.constant 0 : index
      %c0_27 = arith.constant 0 : index
      %35 = vector.load %arg8[%c0_26, %c0_27] : memref<8x128xf32, #tpu.memory_space<vmem>>, vector<8x128xf32>
      %36 = arith.mulf %4, %4 : vector<16x128xf32>
      %37 = vector.shape_cast %36 : vector<16x128xf32> to vector<2x8x128xf32>
      %cst_28 = arith.constant dense<0.000000e+00> : vector<8x128xf32>
      %38 = vector.multi_reduction <add>, %37, %cst_28 [0] : vector<2x8x128xf32> to vector<8x128xf32>
      %39 = arith.addf %35, %38 : vector<8x128xf32>
      %c0_29 = arith.constant 0 : index
      %c0_30 = arith.constant 0 : index
      %40 = vector.load %arg8[%c0_29, %c0_30] : memref<8x128xf32, #tpu.memory_space<vmem>>, vector<8x128xf32>
      tpu.vector_store %arg8[%c0_29, %c0_30], %39 {strides = array<i32>} : memref<8x128xf32, #tpu.memory_space<vmem>>, vector<8x128xf32>,
      %c0_31 = arith.constant 0 : index
      %c0_32 = arith.constant 0 : index
      %41 = vector.load %arg9[%c0_31, %c0_32] : memref<8x128xf32, #tpu.memory_space<vmem>>, vector<8x128xf32>
      %42 = arith.mulf %3, %4 : vector<16x128xf32>
      %43 = vector.shape_cast %42 : vector<16x128xf32> to vector<2x8x128xf32>
      %cst_33 = arith.constant dense<0.000000e+00> : vector<8x128xf32>
      %44 = vector.multi_reduction <add>, %43, %cst_33 [0] : vector<2x8x128xf32> to vector<8x128xf32>
      %45 = arith.addf %41, %44 : vector<8x128xf32>
      %c0_34 = arith.constant 0 : index
      %c0_35 = arith.constant 0 : index
      %46 = vector.load %arg9[%c0_34, %c0_35] : memref<8x128xf32, #tpu.memory_space<vmem>>, vector<8x128xf32>
      tpu.vector_store %arg9[%c0_34, %c0_35], %45 {strides = array<i32>} : memref<8x128xf32, #tpu.memory_space<vmem>>, vector<8x128xf32>,
    } else {
    }
    %c16_i32_7 = arith.constant 16 : i32
    %12 = arith.addi %7, %c16_i32_7 : i32
    %c16_i32_8 = arith.constant 16 : i32
    %13 = arith.cmpi sgt, %12, %c16_i32_8 : i32
    %14 = arith.extui %13 : i1 to i32
    %c0_i32_9 = arith.constant 0 : i32
    %15 = arith.cmpi ne, %14, %c0_i32_9 : i32
    scf.if %15 {
      %19 = tpu.iota {dimensions = array<i32: 0>} : vector<16x128xi32>
      %20 = vector.broadcast %7 : i32 to vector<16x128xi32>
      %21 = arith.addi %20, %19 : vector<16x128xi32>
      %c16_i32_12 = arith.constant 16 : i32
      %22 = vector.broadcast %c16_i32_12 : i32 to vector<16x128xi32>
      %23 = arith.cmpi slt, %21, %22 : vector<16x128xi32>
      %cst = arith.constant 0.000000e+00 : f32
      %24 = vector.broadcast %cst : f32 to vector<16x128xf32>
      %25 = arith.select %23, %3, %24 : vector<16x128xi1>, vector<16x128xf32>
      %cst_13 = arith.constant 0.000000e+00 : f32
      %26 = vector.broadcast %cst_13 : f32 to vector<16x128xf32>
      %27 = arith.select %23, %4, %26 : vector<16x128xi1>, vector<16x128xf32>
      %c0_14 = arith.constant 0 : index
      %c0_15 = arith.constant 0 : index
      %28 = vector.load %arg5[%c0_14, %c0_15] : memref<8x128xf32, #tpu.memory_space<vmem>>, vector<8x128xf32>
      %29 = vector.shape_cast %25 : vector<16x128xf32> to vector<2x8x128xf32>
      %cst_16 = arith.constant dense<0.000000e+00> : vector<8x128xf32>
      %30 = vector.multi_reduction <add>, %29, %cst_16 [0] : vector<2x8x128xf32> to vector<8x128xf32>
      %31 = arith.addf %28, %30 : vector<8x128xf32>
      %c0_17 = arith.constant 0 : index
      %c0_18 = arith.constant 0 : index
      %32 = vector.load %arg5[%c0_17, %c0_18] : memref<8x128xf32, #tpu.memory_space<vmem>>, vector<8x128xf32>
      tpu.vector_store %arg5[%c0_17, %c0_18], %31 {strides = array<i32>} : memref<8x128xf32, #tpu.memory_space<vmem>>, vector<8x128xf32>,
      %c0_19 = arith.constant 0 : index
      %c0_20 = arith.constant 0 : index
      %33 = vector.load %arg6[%c0_19, %c0_20] : memref<8x128xf32, #tpu.memory_space<vmem>>, vector<8x128xf32>
      %34 = vector.shape_cast %27 : vector<16x128xf32> to vector<2x8x128xf32>
      %cst_21 = arith.constant dense<0.000000e+00> : vector<8x128xf32>
      %35 = vector.multi_reduction <add>, %34, %cst_21 [0] : vector<2x8x128xf32> to vector<8x128xf32>
      %36 = arith.addf %33, %35 : vector<8x128xf32>
      %c0_22 = arith.constant 0 : index
      %c0_23 = arith.constant 0 : index
      %37 = vector.load %arg6[%c0_22, %c0_23] : memref<8x128xf32, #tpu.memory_space<vmem>>, vector<8x128xf32>
      tpu.vector_store %arg6[%c0_22, %c0_23], %36 {strides = array<i32>} : memref<8x128xf32, #tpu.memory_space<vmem>>, vector<8x128xf32>,
      %c0_24 = arith.constant 0 : index
      %c0_25 = arith.constant 0 : index
      %38 = vector.load %arg7[%c0_24, %c0_25] : memref<8x128xf32, #tpu.memory_space<vmem>>, vector<8x128xf32>
      %39 = arith.mulf %25, %25 : vector<16x128xf32>
      %40 = vector.shape_cast %39 : vector<16x128xf32> to vector<2x8x128xf32>
      %cst_26 = arith.constant dense<0.000000e+00> : vector<8x128xf32>
      %41 = vector.multi_reduction <add>, %40, %cst_26 [0] : vector<2x8x128xf32> to vector<8x128xf32>
      %42 = arith.addf %38, %41 : vector<8x128xf32>
      %c0_27 = arith.constant 0 : index
      %c0_28 = arith.constant 0 : index
      %43 = vector.load %arg7[%c0_27, %c0_28] : memref<8x128xf32, #tpu.memory_space<vmem>>, vector<8x128xf32>
      tpu.vector_store %arg7[%c0_27, %c0_28], %42 {strides = array<i32>} : memref<8x128xf32, #tpu.memory_space<vmem>>, vector<8x128xf32>,
      %c0_29 = arith.constant 0 : index
      %c0_30 = arith.constant 0 : index
      %44 = vector.load %arg8[%c0_29, %c0_30] : memref<8x128xf32, #tpu.memory_space<vmem>>, vector<8x128xf32>
      %45 = arith.mulf %27, %27 : vector<16x128xf32>
      %46 = vector.shape_cast %45 : vector<16x128xf32> to vector<2x8x128xf32>
      %cst_31 = arith.constant dense<0.000000e+00> : vector<8x128xf32>
      %47 = vector.multi_reduction <add>, %46, %cst_31 [0] : vector<2x8x128xf32> to vector<8x128xf32>
      %48 = arith.addf %44, %47 : vector<8x128xf32>
      %c0_32 = arith.constant 0 : index
      %c0_33 = arith.constant 0 : index
      %49 = vector.load %arg8[%c0_32, %c0_33] : memref<8x128xf32, #tpu.memory_space<vmem>>, vector<8x128xf32>
      tpu.vector_store %arg8[%c0_32, %c0_33], %48 {strides = array<i32>} : memref<8x128xf32, #tpu.memory_space<vmem>>, vector<8x128xf32>,
      %c0_34 = arith.constant 0 : index
      %c0_35 = arith.constant 0 : index
      %50 = vector.load %arg9[%c0_34, %c0_35] : memref<8x128xf32, #tpu.memory_space<vmem>>, vector<8x128xf32>
      %51 = arith.mulf %25, %27 : vector<16x128xf32>
      %52 = vector.shape_cast %51 : vector<16x128xf32> to vector<2x8x128xf32>
      %cst_36 = arith.constant dense<0.000000e+00> : vector<8x128xf32>
      %53 = vector.multi_reduction <add>, %52, %cst_36 [0] : vector<2x8x128xf32> to vector<8x128xf32>
      %54 = arith.addf %50, %53 : vector<8x128xf32>
      %c0_37 = arith.constant 0 : index
      %c0_38 = arith.constant 0 : index
      %55 = vector.load %arg9[%c0_37, %c0_38] : memref<8x128xf32, #tpu.memory_space<vmem>>, vector<8x128xf32>
      tpu.vector_store %arg9[%c0_37, %c0_38], %54 {strides = array<i32>} : memref<8x128xf32, #tpu.memory_space<vmem>>, vector<8x128xf32>,
    } else {
    }
    %c0_i32_10 = arith.constant 0 : i32
    %16 = arith.cmpi eq, %arg1, %c0_i32_10 : i32
    %17 = arith.extui %16 : i1 to i32
    %c0_i32_11 = arith.constant 0 : i32
    %18 = arith.cmpi ne, %17, %c0_i32_11 : i32
    scf.if %18 {
      %c0_12 = arith.constant 0 : index
      %c0_13 = arith.constant 0 : index
      %19 = vector.load %arg5[%c0_12, %c0_13] : memref<8x128xf32, #tpu.memory_space<vmem>>, vector<8x128xf32>
      %c0_14 = arith.constant 0 : index
      %c0_15 = arith.constant 0 : index
      %c0_16 = arith.constant 0 : index
      %c0_17 = arith.constant 0 : index
      %20 = vector.load %arg4[%c0_14, %c0_15, %c0_16, %c0_17] : memref<1x5x8x128xf32, #tpu.memory_space<vmem>>, vector<1x1x8x128xf32>
      %21 = vector.shape_cast %20 : vector<1x1x8x128xf32> to vector<8x128xf32>
      %22 = vector.shape_cast %19 : vector<8x128xf32> to vector<1x1x8x128xf32>
      tpu.vector_store %arg4[%c0_14, %c0_15, %c0_16, %c0_17], %22 {strides = array<i32>} : memref<1x5x8x128xf32, #tpu.memory_space<vmem>>, vector<1x1x8x128xf32>,
      %c0_18 = arith.constant 0 : index
      %c0_19 = arith.constant 0 : index
      %23 = vector.load %arg6[%c0_18, %c0_19] : memref<8x128xf32, #tpu.memory_space<vmem>>, vector<8x128xf32>
      %c0_20 = arith.constant 0 : index
      %c1 = arith.constant 1 : index
      %c0_21 = arith.constant 0 : index
      %c0_22 = arith.constant 0 : index
      %24 = vector.load %arg4[%c0_20, %c1, %c0_21, %c0_22] : memref<1x5x8x128xf32, #tpu.memory_space<vmem>>, vector<1x1x8x128xf32>
      %25 = vector.shape_cast %24 : vector<1x1x8x128xf32> to vector<8x128xf32>
      %26 = vector.shape_cast %23 : vector<8x128xf32> to vector<1x1x8x128xf32>
      tpu.vector_store %arg4[%c0_20, %c1, %c0_21, %c0_22], %26 {strides = array<i32>} : memref<1x5x8x128xf32, #tpu.memory_space<vmem>>, vector<1x1x8x128xf32>,
      %c0_23 = arith.constant 0 : index
      %c0_24 = arith.constant 0 : index
      %27 = vector.load %arg7[%c0_23, %c0_24] : memref<8x128xf32, #tpu.memory_space<vmem>>, vector<8x128xf32>
      %c0_25 = arith.constant 0 : index
      %c2 = arith.constant 2 : index
      %c0_26 = arith.constant 0 : index
      %c0_27 = arith.constant 0 : index
      %28 = vector.load %arg4[%c0_25, %c2, %c0_26, %c0_27] : memref<1x5x8x128xf32, #tpu.memory_space<vmem>>, vector<1x1x8x128xf32>
      %29 = vector.shape_cast %28 : vector<1x1x8x128xf32> to vector<8x128xf32>
      %30 = vector.shape_cast %27 : vector<8x128xf32> to vector<1x1x8x128xf32>
      tpu.vector_store %arg4[%c0_25, %c2, %c0_26, %c0_27], %30 {strides = array<i32>} : memref<1x5x8x128xf32, #tpu.memory_space<vmem>>, vector<1x1x8x128xf32>,
      %c0_28 = arith.constant 0 : index
      %c0_29 = arith.constant 0 : index
      %31 = vector.load %arg8[%c0_28, %c0_29] : memref<8x128xf32, #tpu.memory_space<vmem>>, vector<8x128xf32>
      %c0_30 = arith.constant 0 : index
      %c3 = arith.constant 3 : index
      %c0_31 = arith.constant 0 : index
      %c0_32 = arith.constant 0 : index
      %32 = vector.load %arg4[%c0_30, %c3, %c0_31, %c0_32] : memref<1x5x8x128xf32, #tpu.memory_space<vmem>>, vector<1x1x8x128xf32>
      %33 = vector.shape_cast %32 : vector<1x1x8x128xf32> to vector<8x128xf32>
      %34 = vector.shape_cast %31 : vector<8x128xf32> to vector<1x1x8x128xf32>
      tpu.vector_store %arg4[%c0_30, %c3, %c0_31, %c0_32], %34 {strides = array<i32>} : memref<1x5x8x128xf32, #tpu.memory_space<vmem>>, vector<1x1x8x128xf32>,
      %c0_33 = arith.constant 0 : index
      %c0_34 = arith.constant 0 : index
      %35 = vector.load %arg9[%c0_33, %c0_34] : memref<8x128xf32, #tpu.memory_space<vmem>>, vector<8x128xf32>
      %c0_35 = arith.constant 0 : index
      %c4 = arith.constant 4 : index
      %c0_36 = arith.constant 0 : index
      %c0_37 = arith.constant 0 : index
      %36 = vector.load %arg4[%c0_35, %c4, %c0_36, %c0_37] : memref<1x5x8x128xf32, #tpu.memory_space<vmem>>, vector<1x1x8x128xf32>
      %37 = vector.shape_cast %36 : vector<1x1x8x128xf32> to vector<8x128xf32>
      %38 = vector.shape_cast %35 : vector<8x128xf32> to vector<1x1x8x128xf32>
      tpu.vector_store %arg4[%c0_35, %c4, %c0_36, %c0_37], %38 {strides = array<i32>} : memref<1x5x8x128xf32, #tpu.memory_space<vmem>>, vector<1x1x8x128xf32>,
    } else {
    }
    return
  }
  func.func @transform_0(%arg0: i32, %arg1: i32) -> (i32, i32) {
    %c1_i32 = arith.constant 1 : i32
    %0 = arith.muli %arg0, %c1_i32 : i32
    %1 = arith.addi %0, %arg1 : i32
    %c0_i32 = arith.constant 0 : i32
    %2 = arith.minsi %1, %c0_i32 : i32
    %c0_i32_0 = arith.constant 0 : i32
    %c0_i32_1 = arith.constant 0 : i32
    return %2, %c0_i32_0 : i32, i32
  }
  func.func @transform_1(%arg0: i32, %arg1: i32) -> (i32, i32) {
    %c1_i32 = arith.constant 1 : i32
    %0 = arith.muli %arg0, %c1_i32 : i32
    %1 = arith.addi %0, %arg1 : i32
    %c0_i32 = arith.constant 0 : i32
    %2 = arith.minsi %1, %c0_i32 : i32
    %c0_i32_0 = arith.constant 0 : i32
    %c0_i32_1 = arith.constant 0 : i32
    return %2, %c0_i32_0 : i32, i32
  }
  func.func @transform_2(%arg0: i32, %arg1: i32) -> (i32, i32, i32, i32) {
    %c0_i32 = arith.constant 0 : i32
    %c0_i32_0 = arith.constant 0 : i32
    %c0_i32_1 = arith.constant 0 : i32
    %c0_i32_2 = arith.constant 0 : i32
    return %arg0, %c0_i32, %c0_i32_0, %c0_i32_1 : i32, i32, i32, i32
  }
}

</mosaic_0001>

<bundles_post_ra>
// kernel: kge_mse_loss.1
= control target key start
LH: loop header
LB: loop body
LE: loop exit
PB: predicated region body
PF: predicated region fallthrough
CT: control target
= control target key end

     0   :  { %s242_s0 = inlined_call_operand.vmem [shape: f32[16,128], index: 0, kind: input, shape index: {}]   ;;  %s243_s1 = inlined_call_operand.vmem [shape: f32[16,128], index: 1, kind: input, shape index: {}]   ;;  %s244_s2 = inlined_call_operand.vmem [shape: f32[1,5,8,128], index: 2, kind: output, shape index: {}]  }
   0x1   :  { %v84_v0 = vld [vmem:[%s242_s0] sm:$0xff]  ;;  %v85_v1 = vld [vmem:[%s242_s0 + $0x8] sm:$0xff] }
   0x2   :  { %v86_v2 = vld [vmem:[%s243_s1] sm:$0xff]  ;;  %v96_v3 = vadd.f32 %v85_v1, %v84_v0  ;;  %v87_v4 = vld [vmem:[%s243_s1 + $0x8] sm:$0xff]  ;;  %v104_v5 = vmul.f32 %v84_v0, %v84_v0  ;;  %v105_v6 = vmul.f32 %v85_v1, %v85_v1 }
   0x3   :  { %v110_v7 = vmul.f32 %v86_v2, %v86_v2  ;;  %v100_v8 = vadd.f32 %v87_v4, %v86_v2  ;;  %v111_v9 = vmul.f32 %v87_v4, %v87_v4  ;;  %v116_v10 = vmul.f32 %v86_v2, %v84_v0 }
   0x4   :  { %v117_v11 = vmul.f32 %v87_v4, %v85_v1  ;;  %167 = vst [vmem:[%s244_s2] sm:$0xff] %v96_v3  ;;  %v106_v12 = vadd.f32 %v105_v6, %v104_v5 }
   0x5   :  { %196 = vst [vmem:[%s244_s2 + $0x8] sm:$0xff] %v100_v8  ;;  %v112_v13 = vadd.f32 %v111_v9, %v110_v7 }
   0x6   :  { %v118_v14 = vadd.f32 %v117_v11, %v116_v10  ;;  %197 = vst [vmem:[%s244_s2 + $0x10] sm:$0xff] %v106_v12 }
   0x7   :  { %198 = vst [vmem:[%s244_s2 + $0x18] sm:$0xff] %v112_v13 }
   0x8   :  { %199 = vst [vmem:[%s244_s2 + $0x20] sm:$0xff] %v118_v14 }

</bundles_post_ra>
